<compile_context>
chip_gen: v7x
topology: tpu7x:2x2x1
jax: 0.10.0
libtpu: 0.0.40
codegen_flags: <defaults>
</compile_context>

<pallas_src>
import math

import numpy as np
import jax
import jax.numpy as jnp
from jax.experimental import pallas as pl
from jax.experimental.pallas import tpu as pltpu  # noqa: F401  (CompilerParams if scaled up)

# ----------------------------- configuration -----------------------------
B = 2                       # batch
S = 8                       # sequence length (== max_seq_len)
D = 32                      # d_model
NUM_HEADS = 4
HEAD_DIM = D // NUM_HEADS
HIDDEN = 4 * D              # MLP hidden dim (= 128 = one full lane width)
T = B * S                   # total tokens
C = NUM_HEADS * T           # attention column axis: (head, batch, key-pos)
EPS = float(jnp.finfo(jnp.float32).eps)   # nn.RMSNorm default eps (f32)
SM_SCALE = 1.0 / math.sqrt(HEAD_DIM)
NEG_INF = -1e30


# ----------------------------- fused kernel ------------------------------
def llama_block_kernel(x_ref, n1w_ref, wqkv_ref, wo_ref, wgu_ref, wd_ref,
                       rope_ref, const_ref, o_ref):
    f32 = jnp.float32
    x = x_ref[...]                                            # (T, D)

    # ---- RMSNorm1 ----
    x1 = x * jax.lax.rsqrt(jnp.mean(x * x, axis=-1, keepdims=True) + EPS)
    x1 = x1 * n1w_ref[...]

    # ---- fused q / q_rot / k / k_rot / v projection (one MXU launch) ----
    # rotate-half permutation and the softmax scale are folded into the
    # weights host-side; RoPE is one elementwise multiply with the packed
    # [cos | sin | cos | sin | 1] table followed by two slice-adds.
    proj = jnp.dot(x1, wqkv_ref[...], preferred_element_type=f32)   # (T, 5D)
    pm = proj * rope_ref[...]     # [q*cos | q_rot*sin | k*cos | k_rot*sin | v]
    q = pm[:, 0 * D:1 * D] + pm[:, 1 * D:2 * D]   # RoPE'd, pre-scaled q
    k = pm[:, 2 * D:3 * D] + pm[:, 3 * D:4 * D]   # RoPE'd k
    v = pm[:, 4 * D:5 * D]

    # ---- attention: every (batch, head) pair with three 2-D matmuls ----
    # Score columns are indexed by (head, batch, key position).  The replicated
    # K/V rows are masked so each head only sees its own D-slice, making the
    # full-D contraction exact (extra MACs are zeros).
    bias = const_ref[0:T, :]                      # (T, C) causal + cross-batch
    segsum = const_ref[T:T + C, :]                # (C, C) per-head block ones
    hmask = const_ref[T + C:T + 2 * C, 0:D]       # (C, D) head selector
    k_rep = jnp.concatenate([k] * NUM_HEADS, axis=0) * hmask   # (C, D)
    v_rep = jnp.concatenate([v] * NUM_HEADS, axis=0) * hmask   # (C, D)

    # "NT" matmul: the k-transpose is folded into the dot_general contraction.
    sc = jax.lax.dot_general(q, k_rep, (((1,), (1,)), ((), ())),
                             preferred_element_type=f32) + bias

    # Softmax per (head, batch) segment.  A shared per-row shift keeps it
    # numerically stable and is mathematically identical within each segment.
    # Cross-batch / non-causal entries have exp == 0 exactly, so the per-head
    # segment sum already equals the per-(head, batch) sum (no dfix needed).
    m = jnp.max(sc, axis=-1, keepdims=True)
    e = jnp.exp(sc - m)
    denom = jnp.dot(e, segsum, preferred_element_type=f32)
    # Guard against a whole head-row underflowing under the shared max
    # (cannot happen at this scale, but keeps the 1/0 path out entirely).
    denom = jnp.maximum(denom, 1e-30)
    inv = pl.reciprocal(denom, approx=True)       # EUP slot
    inv = inv * (2.0 - denom * inv)               # one Newton step -> ~exact
    p = e * inv

    attn = jnp.dot(p, v_rep, preferred_element_type=f32)       # (T, D)
    h1 = x1 + jnp.dot(attn, wo_ref[...], preferred_element_type=f32)

    # ---- RMSNorm2 (weight folded into w_gu) + SwiGLU MLP (fused gate|up) ----
    x2 = h1 * jax.lax.rsqrt(jnp.mean(h1 * h1, axis=-1, keepdims=True) + EPS)
    gu = jnp.dot(x2, wgu_ref[...], preferred_element_type=f32)  # (T, 2*HIDDEN)
    g = gu[:, :HIDDEN]                                          # free split
    u = gu[:, HIDDEN:]                                          # (vreg boundary)
    act = g * (u * jax.nn.sigmoid(u))                           # gate * silu(up)
    o_ref[...] = h1 + jnp.dot(act, wd_ref[...], preferred_element_type=f32)


# ----------------------------- wrapper ------------------------------------
def llama_decoder_block(x, packed):
    (n1w, w_qkv, wo, w_gu, wd, rope_mult, attn_const) = packed
    x2d = x.reshape(T, D)      # host-side layout plumbing (free)
    out2d = pl.pallas_call(
        llama_block_kernel,
        out_shape=jax.ShapeDtypeStruct((T, D), jnp.float32),
        # no grid: whole problem fits VMEM, single invocation, single launch
    )(x2d, n1w, w_qkv, wo, w_gu, wd, rope_mult, attn_const)
    return out2d.reshape(B, S, D)


# ----------------------------- host-side constants -------------------------
def rope_tables():
    inv_freq = 1.0 / (10000.0 ** (np.arange(0, HEAD_DIM, 2, dtype=np.float32)
                                  / HEAD_DIM))
    pos = np.arange(S, dtype=np.float32)
    freqs = np.outer(pos, inv_freq)                    # (S, HEAD_DIM // 2)
    emb = np.concatenate([freqs, freqs], axis=-1)      # (S, HEAD_DIM)
    return np.cos(emb).astype(np.float32), np.sin(emb).astype(np.float32)


def build_packed_params(weights, cos_head, sin_head):
    (n1w, wq, wk, wv, wo, n2w, wg, wu, wd) = weights

    # RoPE tables tiled over batch (rows) and heads (columns): (T, D)
    cos_full = np.tile(cos_head, (B, NUM_HEADS))
    sin_full = np.tile(sin_head, (B, NUM_HEADS))

    # rotate_half as a signed permutation: (x @ rot) == rotate_half(x) per head
    rot = np.zeros((D, D), np.float32)
    half = HEAD_DIM // 2
    for h in range(NUM_HEADS):
        o = h * HEAD_DIM
        for i in range(half):
            rot[o + half + i, o + i] = -1.0   # out[:, o+i]      = -x[:, o+half+i]
            rot[o + i, o + half + i] = 1.0    # out[:, o+half+i] =  x[:, o+i]

    # fused projection weight: [wq*s | (wq@rot)*s | wk | wk@rot | wv]  (D, 5D)
    wq_np, wk_np, wv_np = (np.asarray(a, np.float32) for a in (wq, wk, wv))
    w_qkv = np.concatenate(
        [wq_np * SM_SCALE, (wq_np @ rot) * SM_SCALE, wk_np, wk_np @ rot, wv_np],
        axis=1)

    # matching RoPE multiplier table: [cos | sin | cos | sin | 1]  (T, 5D)
    rope_mult = np.concatenate(
        [cos_full, sin_full, cos_full, sin_full, np.ones((T, D), np.float32)],
        axis=1)

    # RMSNorm2 weight folded into the fused gate|up weight  (D, 2*HIDDEN)
    n2 = np.asarray(n2w, np.float32)[0][:, None]
    w_gu = np.concatenate([n2 * np.asarray(wg, np.float32),
                           n2 * np.asarray(wu, np.float32)], axis=1)

    # ---- attention constants packed into one lane-dense (T + 2C, C) slab ----
    # rows [0, T)        : additive score bias (causal within batch, -inf across)
    # rows [T, T+C)      : per-head block-diagonal ones -> segment sums of exp
    # rows [T+C, T+2C)   : head-selector mask for replicated K/V (cols [0, D))
    bias = np.full((T, C), NEG_INF, dtype=np.float32)
    for h in range(NUM_HEADS):
        for b in range(B):
            for s in range(S):
                bias[b * S + s, h * T + b * S: h * T + b * S + s + 1] = 0.0
    segsum = np.kron(np.eye(NUM_HEADS, dtype=np.float32),
                     np.ones((T, T), dtype=np.float32))           # (C, C)
    hmask = np.zeros((C, C), np.float32)
    for h in range(NUM_HEADS):
        hmask[h * T:(h + 1) * T, h * HEAD_DIM:(h + 1) * HEAD_DIM] = 1.0
    attn_const = np.concatenate([bias, segsum, hmask], axis=0)    # (144, 64)

    f32 = lambda a: jnp.asarray(a, jnp.float32)
    return (f32(n1w), f32(w_qkv), f32(wo), f32(w_gu), f32(wd),
            f32(rope_mult), f32(attn_const))


# ----------------------------- pure-JAX reference --------------------------
def _rmsnorm_ref(x, w):
    return x * jax.lax.rsqrt(jnp.mean(x * x, axis=-1, keepdims=True) + EPS) * w


def reference(x, weights, cos_head, sin_head):
    (n1w, wq, wk, wv, wo, n2w, wg, wu, wd) = weights
    x1 = _rmsnorm_ref(x, n1w[0])
    q = x1 @ wq
    k = x1 @ wk
    v = x1 @ wv

    def rot(t):  # t: (B, S, H, hd)
        h = t.shape[-1] // 2
        return jnp.concatenate([-t[..., h:], t[..., :h]], axis=-1)

    qh = q.reshape(B, S, NUM_HEADS, HEAD_DIM)
    kh = k.reshape(B, S, NUM_HEADS, HEAD_DIM)
    vh = v.reshape(B, S, NUM_HEADS, HEAD_DIM)
    c = cos_head[None, :, None, :]
    s = sin_head[None, :, None, :]
    qh = qh * c + rot(qh) * s
    kh = kh * c + rot(kh) * s
    sc = jnp.einsum("bqhd,bkhd->bhqk", qh, kh) * SM_SCALE
    causal = jnp.tril(jnp.ones((S, S), bool))
    sc = jnp.where(causal[None, None], sc, NEG_INF)
    p = jax.nn.softmax(sc, axis=-1)
    o = jnp.einsum("bhqk,bkhd->bqhd", p, vh).reshape(B, S, D)
    x2 = x1 + o @ wo
    n = _rmsnorm_ref(x2, n2w[0])
    mlp = ((n @ wg) * jax.nn.silu(n @ wu)) @ wd
    return x2 + mlp


# ----------------------------- main ----------------------------------------
if __name__ == "__main__":
    key = jax.random.PRNGKey(0)
    ks = jax.random.split(key, 8)

    x = jax.random.normal(ks[0], (B, S, D), jnp.float32)

    scale_d = 1.0 / math.sqrt(D)
    scale_h = 1.0 / math.sqrt(HIDDEN)
    n1w = jnp.ones((1, D), jnp.float32)
    n2w = jnp.ones((1, D), jnp.float32)
    wq = jax.random.normal(ks[1], (D, D), jnp.float32) * scale_d
    wk = jax.random.normal(ks[2], (D, D), jnp.float32) * scale_d
    wv = jax.random.normal(ks[3], (D, D), jnp.float32) * scale_d
    wo = jax.random.normal(ks[4], (D, D), jnp.float32) * scale_d
    wg = jax.random.normal(ks[5], (D, HIDDEN), jnp.float32) * scale_d
    wu = jax.random.normal(ks[6], (D, HIDDEN), jnp.float32) * scale_d
    wd = jax.random.normal(ks[7], (HIDDEN, D), jnp.float32) * scale_h
    weights = (n1w, wq, wk, wv, wo, n2w, wg, wu, wd)

    cos_head, sin_head = rope_tables()
    packed = build_packed_params(weights, cos_head, sin_head)

    out = llama_decoder_block(x, packed)
    out = jax.block_until_ready(out)

    ref = reference(x, weights, jnp.asarray(cos_head), jnp.asarray(sin_head))
    assert out.shape == (B, S, D)
    max_err = float(jnp.max(jnp.abs(out - ref)))
    assert jnp.allclose(out, ref, atol=1e-4, rtol=1e-4), max_err

    print("KERNEL_OK")
</pallas_src>

<mosaic_0001>
module attributes {stable_mosaic.version = 11 : i64} {
  func.func @llama_block_kernel(%arg0: memref<16x32xf32, #tpu.memory_space<vmem>>, %arg1: memref<1x32xf32, #tpu.memory_space<vmem>>, %arg2: memref<32x160xf32, #tpu.memory_space<vmem>>, %arg3: memref<32x32xf32, #tpu.memory_space<vmem>>, %arg4: memref<32x256xf32, #tpu.memory_space<vmem>>, %arg5: memref<128x32xf32, #tpu.memory_space<vmem>>, %arg6: memref<16x160xf32, #tpu.memory_space<vmem>>, %arg7: memref<144x64xf32, #tpu.memory_space<vmem>>, %arg8: memref<16x32xf32, #tpu.memory_space<vmem>>) attributes {dimension_semantics = [], scalar_prefetch = 0 : i64, scratch_operands = 0 : i64, tpu.core_type = #tpu.core_type<tc>} {
    %c0 = arith.constant 0 : index
    %c0_0 = arith.constant 0 : index
    %0 = vector.load %arg0[%c0, %c0_0] : memref<16x32xf32, #tpu.memory_space<vmem>>, vector<16x32xf32>
    %1 = arith.mulf %0, %0 : vector<16x32xf32>
    %cst = arith.constant dense<0.000000e+00> : vector<16xf32>
    %2 = vector.multi_reduction <add>, %1, %cst [1] : vector<16x32xf32> to vector<16xf32>
    %3 = vector.shape_cast %2 : vector<16xf32> to vector<16x1xf32>
    %cst_1 = arith.constant 3.200000e+01 : f32
    %4 = vector.broadcast %cst_1 : f32 to vector<16x1xf32>
    %5 = arith.divf %3, %4 : vector<16x1xf32>
    %cst_2 = arith.constant 1.1920929E-7 : f32
    %6 = vector.broadcast %cst_2 : f32 to vector<16x1xf32>
    %7 = arith.addf %5, %6 : vector<16x1xf32>
    %8 = math.rsqrt %7 : vector<16x1xf32>
    %9 = vector.broadcast %8 : vector<16x1xf32> to vector<16x32xf32>
    %10 = arith.mulf %0, %9 : vector<16x32xf32>
    %c0_3 = arith.constant 0 : index
    %c0_4 = arith.constant 0 : index
    %11 = vector.load %arg1[%c0_3, %c0_4] : memref<1x32xf32, #tpu.memory_space<vmem>>, vector<1x32xf32>
    %12 = vector.broadcast %11 : vector<1x32xf32> to vector<16x32xf32>
    %13 = arith.mulf %10, %12 : vector<16x32xf32>
    %c0_5 = arith.constant 0 : index
    %c0_6 = arith.constant 0 : index
    %14 = vector.load %arg2[%c0_5, %c0_6] : memref<32x160xf32, #tpu.memory_space<vmem>>, vector<32x160xf32>
    %cst_7 = arith.constant dense<0.000000e+00> : vector<16x160xf32>
    %15 = tpu.matmul %13, %14, %cst_7 {dimension_numbers = #tpu.dot_dimension_numbers<[1], [0], [0], [1], [0, 0, 1, 1], [], []>} : vector<16x32xf32>, vector<32x160xf32>, vector<16x160xf32> -> vector<16x160xf32>
    %c0_8 = arith.constant 0 : index
    %c0_9 = arith.constant 0 : index
    %16 = vector.load %arg6[%c0_8, %c0_9] : memref<16x160xf32, #tpu.memory_space<vmem>>, vector<16x160xf32>
    %17 = arith.mulf %15, %16 : vector<16x160xf32>
    %18 = vector.extract_strided_slice %17 {offsets = [0, 0], sizes = [16, 32], strides = [1, 1]} : vector<16x160xf32> to vector<16x32xf32>
    %19 = vector.extract_strided_slice %17 {offsets = [0, 32], sizes = [16, 32], strides = [1, 1]} : vector<16x160xf32> to vector<16x32xf32>
    %20 = arith.addf %18, %19 : vector<16x32xf32>
    %21 = vector.extract_strided_slice %17 {offsets = [0, 64], sizes = [16, 32], strides = [1, 1]} : vector<16x160xf32> to vector<16x32xf32>
    %22 = vector.extract_strided_slice %17 {offsets = [0, 96], sizes = [16, 32], strides = [1, 1]} : vector<16x160xf32> to vector<16x32xf32>
    %23 = arith.addf %21, %22 : vector<16x32xf32>
    %24 = vector.extract_strided_slice %17 {offsets = [0, 128], sizes = [16, 32], strides = [1, 1]} : vector<16x160xf32> to vector<16x32xf32>
    %c0_10 = arith.constant 0 : index
    %c0_11 = arith.constant 0 : index
    %25 = vector.load %arg7[%c0_10, %c0_11] : memref<144x64xf32, #tpu.memory_space<vmem>>, vector<16x64xf32>
    %c16 = arith.constant 16 : index
    %c0_12 = arith.constant 0 : index
    %26 = vector.load %arg7[%c16, %c0_12] : memref<144x64xf32, #tpu.memory_space<vmem>>, vector<64x64xf32>
    %c80 = arith.constant 80 : index
    %c0_13 = arith.constant 0 : index
    %27 = vector.load %arg7[%c80, %c0_13] : memref<144x64xf32, #tpu.memory_space<vmem>>, vector<64x32xf32>
    %28 = tpu.concatenate %23, %23, %23, %23 in 0 : vector<16x32xf32>, vector<16x32xf32>, vector<16x32xf32>, vector<16x32xf32> -> vector<64x32xf32>
    %29 = arith.mulf %28, %27 : vector<64x32xf32>
    %30 = tpu.concatenate %24, %24, %24, %24 in 0 : vector<16x32xf32>, vector<16x32xf32>, vector<16x32xf32>, vector<16x32xf32> -> vector<64x32xf32>
    %31 = arith.mulf %30, %27 : vector<64x32xf32>
    %cst_14 = arith.constant dense<0.000000e+00> : vector<16x64xf32>
    %32 = tpu.matmul %20, %29, %cst_14 {dimension_numbers = #tpu.dot_dimension_numbers<[1], [1], [0], [0], [0, 0, 1, 0], [], []>} : vector<16x32xf32>, vector<64x32xf32>, vector<16x64xf32> -> vector<16x64xf32>
    %33 = arith.addf %32, %25 : vector<16x64xf32>
    %cst_15 = arith.constant dense<0xFF800000> : vector<16xf32>
    %34 = vector.multi_reduction <maximumf>, %33, %cst_15 [1] : vector<16x64xf32> to vector<16xf32>
    %35 = vector.shape_cast %34 : vector<16xf32> to vector<16x1xf32>
    %36 = vector.broadcast %35 : vector<16x1xf32> to vector<16x64xf32>
    %37 = arith.subf %33, %36 : vector<16x64xf32>
    %38 = math.exp %37 : vector<16x64xf32>
    %cst_16 = arith.constant dense<0.000000e+00> : vector<16x64xf32>
    %39 = tpu.matmul %38, %26, %cst_16 {dimension_numbers = #tpu.dot_dimension_numbers<[1], [0], [0], [1], [0, 0, 1, 1], [], []>} : vector<16x64xf32>, vector<64x64xf32>, vector<16x64xf32> -> vector<16x64xf32>
    %cst_17 = arith.constant 1.000000e-30 : f32
    %40 = vector.broadcast %cst_17 : f32 to vector<16x64xf32>
    %41 = arith.maximumf %39, %40 : vector<16x64xf32>
    %42 = tpu.reciprocal %41 {approx = true} : vector<16x64xf32> -> vector<16x64xf32>
    %43 = arith.mulf %41, %42 : vector<16x64xf32>
    %cst_18 = arith.constant 2.000000e+00 : f32
    %44 = vector.broadcast %cst_18 : f32 to vector<16x64xf32>
    %45 = arith.subf %44, %43 : vector<16x64xf32>
    %46 = arith.mulf %42, %45 : vector<16x64xf32>
    %47 = arith.mulf %38, %46 : vector<16x64xf32>
    %cst_19 = arith.constant dense<0.000000e+00> : vector<16x32xf32>
    %48 = tpu.matmul %47, %31, %cst_19 {dimension_numbers = #tpu.dot_dimension_numbers<[1], [0], [0], [1], [0, 0, 1, 1], [], []>} : vector<16x64xf32>, vector<64x32xf32>, vector<16x32xf32> -> vector<16x32xf32>
    %c0_20 = arith.constant 0 : index
    %c0_21 = arith.constant 0 : index
    %49 = vector.load %arg3[%c0_20, %c0_21] : memref<32x32xf32, #tpu.memory_space<vmem>>, vector<32x32xf32>
    %cst_22 = arith.constant dense<0.000000e+00> : vector<16x32xf32>
    %50 = tpu.matmul %48, %49, %cst_22 {dimension_numbers = #tpu.dot_dimension_numbers<[1], [0], [0], [1], [0, 0, 1, 1], [], []>} : vector<16x32xf32>, vector<32x32xf32>, vector<16x32xf32> -> vector<16x32xf32>
    %51 = arith.addf %13, %50 : vector<16x32xf32>
    %52 = arith.mulf %51, %51 : vector<16x32xf32>
    %cst_23 = arith.constant dense<0.000000e+00> : vector<16xf32>
    %53 = vector.multi_reduction <add>, %52, %cst_23 [1] : vector<16x32xf32> to vector<16xf32>
    %54 = vector.shape_cast %53 : vector<16xf32> to vector<16x1xf32>
    %cst_24 = arith.constant 3.200000e+01 : f32
    %55 = vector.broadcast %cst_24 : f32 to vector<16x1xf32>
    %56 = arith.divf %54, %55 : vector<16x1xf32>
    %cst_25 = arith.constant 1.1920929E-7 : f32
    %57 = vector.broadcast %cst_25 : f32 to vector<16x1xf32>
    %58 = arith.addf %56, %57 : vector<16x1xf32>
    %59 = math.rsqrt %58 : vector<16x1xf32>
    %60 = vector.broadcast %59 : vector<16x1xf32> to vector<16x32xf32>
    %61 = arith.mulf %51, %60 : vector<16x32xf32>
    %c0_26 = arith.constant 0 : index
    %c0_27 = arith.constant 0 : index
    %62 = vector.load %arg4[%c0_26, %c0_27] : memref<32x256xf32, #tpu.memory_space<vmem>>, vector<32x256xf32>
    %cst_28 = arith.constant dense<0.000000e+00> : vector<16x256xf32>
    %63 = tpu.matmul %61, %62, %cst_28 {dimension_numbers = #tpu.dot_dimension_numbers<[1], [0], [0], [1], [0, 0, 1, 1], [], []>} : vector<16x32xf32>, vector<32x256xf32>, vector<16x256xf32> -> vector<16x256xf32>
    %64 = vector.extract_strided_slice %63 {offsets = [0, 0], sizes = [16, 128], strides = [1, 1]} : vector<16x256xf32> to vector<16x128xf32>
    %65 = vector.extract_strided_slice %63 {offsets = [0, 128], sizes = [16, 128], strides = [1, 1]} : vector<16x256xf32> to vector<16x128xf32>
    %66 = arith.negf %65 : vector<16x128xf32>
    %67 = math.exp %66 : vector<16x128xf32>
    %cst_29 = arith.constant 1.000000e+00 : f32
    %68 = vector.broadcast %cst_29 : f32 to vector<16x128xf32>
    %69 = arith.addf %68, %67 : vector<16x128xf32>
    %70 = arith.divf %68, %69 : vector<16x128xf32>
    %71 = arith.mulf %65, %70 : vector<16x128xf32>
    %72 = arith.mulf %64, %71 : vector<16x128xf32>
    %c0_30 = arith.constant 0 : index
    %c0_31 = arith.constant 0 : index
    %73 = vector.load %arg5[%c0_30, %c0_31] : memref<128x32xf32, #tpu.memory_space<vmem>>, vector<128x32xf32>
    %cst_32 = arith.constant dense<0.000000e+00> : vector<16x32xf32>
    %74 = tpu.matmul %72, %73, %cst_32 {dimension_numbers = #tpu.dot_dimension_numbers<[1], [0], [0], [1], [0, 0, 1, 1], [], []>} : vector<16x128xf32>, vector<128x32xf32>, vector<16x32xf32> -> vector<16x32xf32>
    %75 = arith.addf %51, %74 : vector<16x32xf32>
    %c0_33 = arith.constant 0 : index
    %c0_34 = arith.constant 0 : index
    %76 = vector.load %arg8[%c0_33, %c0_34] : memref<16x32xf32, #tpu.memory_space<vmem>>, vector<16x32xf32>
    tpu.vector_store %arg8[%c0_33, %c0_34], %75 {strides = array<i32>} : memref<16x32xf32, #tpu.memory_space<vmem>>, vector<16x32xf32>,
    return
  }
}

</mosaic_0001>

<bundles_post_ra>
// kernel: tpu_custom_call.1
= control target key start
LH: loop header
LB: loop body
LE: loop exit
PB: predicated region body
PF: predicated region fallthrough
CT: control target
= control target key end

     0   :  { %vm34_vm0 = vcmask 261120   ;;  %s1569_s0 = inlined_call_operand.vmem [shape: f32[16,32], index: 0, kind: input, shape index: {}]   ;;  %s1570_s1 = inlined_call_operand.vmem [shape: f32[1,32], index: 1, kind: input, shape index: {}]   ;;  %s1571_s2 = inlined_call_operand.vmem [shape: f32[32,160], index: 2, kind: input, shape index: {}]   ;;  %s1572_s3 = inlined_call_operand.vmem [shape: f32[32,32], index: 3, kind: input, shape index: {}]   ;;  %s1573_s4 = inlined_call_operand.vmem [shape: f32[32,256], index: 4, kind: input, shape index: {}]   ;;  %s1574_s5 = inlined_call_operand.vmem [shape: f32[128,32], index: 5, kind: input, shape index: {}]   ;;  %s1575_s6 = inlined_call_operand.vmem [shape: f32[16,160], index: 6, kind: input, shape index: {}]   ;;  %s1576_s7 = inlined_call_operand.vmem [shape: f32[144,64], index: 7, kind: input, shape index: {}]   ;;  %s1577_s8 = inlined_call_operand.hbm [shape: f32[16,32], index: 8, kind: output, shape index: {}]  }
   0x1   :  { %v30_v0 = vld [vmem:[%s1569_s0] sm:$0xff]  ;;  %v31_v1 = vld [vmem:[%s1569_s0 + $0x8] sm:$0xff] }
   0x2   :  { %13 = vsyncpa [#allocation3], 0  ;;  %v32_v2 = vmul.f32 %v30_v0, %v30_v0  ;;  %v33_v3 = vmul.f32 %v31_v1, %v31_v1  ;;  %v60_v6 = vld [vmem:[%s1571_s2 + $0x8] sm:$0xff]  ;;  %v62_v7 = vld [vmem:[%s1571_s2 + $0x18] sm:$0xff]  ;;  %v1229_v13 = vmov 0.0   ;;  %s1230_s15 = smov 64  }
   0x3   :  { %v59_v8 = vld [vmem:[%s1571_s2] sm:$0xff]  ;;  %v1043_v9 = vpack.c.bf16 %v62_v7, %v60_v6  ;;  %v61_v10 = vld [vmem:[%s1571_s2 + $0x10] sm:$0xff]  ;;  %v64_v11 = vld [vmem:[%s1571_s2 + $0x28] sm:$0xff]  ;;  %137 = vmatprep.mubr.f32.mxu0 %v1229_v13  ;;  %s1231_s10 = smov 96   ;;  %vm355_vm2 = vcmask 523264  }
   0x4   :  { %v35_v4 = vsel %vm34_vm0, %v32_v2, 0.0  ;;  %v38_v5 = vsel %vm34_vm0, %v33_v3, 0.0  ;;  %v66_v12 = vld [vmem:[%s1571_s2 + $0x38] sm:$0xff]  ;;  %v1045_v14 = vpack.c.bf16 %v61_v10, %v59_v8  ;;  %v63_v16 = vld [vmem:[%s1571_s2 + $0x20] sm:$0xff]  ;;  %v65_v17 = vld [vmem:[%s1571_s2 + $0x30] sm:$0xff] }
   0x5   :  { %36 = vadd.xlane.f32.xlu0 %v35_v4  ;;  %v1047_v15 = vpack.c.bf16 %v66_v12, %v64_v11  ;;  %1044 = vmatprep.subr.bf16.mxu0 %v1043_v9  ;;  %v1049_v18 = vpack.c.bf16 %v65_v17, %v63_v16  ;;  %v170_v19 = vld [vmem:[%s1576_s7 + $0x10] sm:$0xff]  ;;  %v171_v20 = vld [vmem:[%s1576_s7 + $0x18] sm:$0xff]  ;;  %v863_v29 = vld [vmem:[%s1570_s1] ss:$0 sm:$0xff] }
   0x6   :  { %1046 = vmatpush1.bf16.msra.mxu0 %v1045_v14  ;;  %v1075_v21 = vpack.c.bf16 %v171_v20, %v170_v19  ;;  %v172_v35 = vld [vmem:[%s1576_s7 + $0x20] sm:$0xff]  ;;  %v173_v36 = vld [vmem:[%s1576_s7 + $0x28] sm:$0xff]  ;;  %v178_v38 = vld [vmem:[%s1576_s7 + $0x50] sm:$0xff] }
   0x7   :  { %1048 = vmatprep.subr.bf16.mxu0 %v1047_v15  ;;  %v1079_v37 = vpack.c.bf16 %v173_v36, %v172_v35  ;;  %v174_v39 = vld [vmem:[%s1576_s7 + $0x30] sm:$0xff]  ;;  %v175_v40 = vld [vmem:[%s1576_s7 + $0x38] sm:$0xff]  ;;  %v185_v42 = vld [vmem:[%s1576_s7 + $0x88] sm:$0xff] }
   0x8   :  { %v1083_v41 = vpack.c.bf16 %v175_v40, %v174_v39  ;;  %v176_v43 = vld [vmem:[%s1576_s7 + $0x40] sm:$0xff]  ;;  %v177_v44 = vld [vmem:[%s1576_s7 + $0x48] sm:$0xff]  ;;  %v182_v52 = vld [vmem:[%s1576_s7 + $0x70] sm:$0xff] }
   0x9   :  { %39 = vadd.xlane.f32.xlu0 %v38_v5  ;;  %v1087_v45 = vpack.c.bf16 %v177_v44, %v176_v43  ;;  %v150_v46 = vld [vmem:[%s1575_s6] sm:$0xff]  ;;  %v151_v47 = vld [vmem:[%s1575_s6 + $0x8] sm:$0xff]  ;;  %v152_v55 = vld [vmem:[%s1575_s6 + $0x10] sm:$0xff] }
   0xa   :  { %1050 = vmatpush1.bf16.msra.mxu0 %v1049_v18  ;;  %v180_v51 = vld [vmem:[%s1576_s7 + $0x60] sm:$0xff]  ;;  %v153_v56 = vld [vmem:[%s1575_s6 + $0x18] sm:$0xff]  ;;  %vm1409_vm1 = vmpackc.low %vm34_vm0, %vm34_vm0 }
   0xb   :  { %1076 = vmatprep.subr.bf16.mxu0 %v1075_v21  ;;  %v184_v53 = vld [vmem:[%s1576_s7 + $0x80] sm:$0xff]  ;;  %v179_v63 = vld [vmem:[%s1576_s7 + $0x58] sm:$0xff] }
  0x1f   :  { %194 = vrot.lane.b32.xlu0 %v178_v38, %s1230_s15 }
  0x23   :  { %208 = vrot.lane.b32.xlu0 %v185_v42, %s1230_s15 }
  0x92   :  { %v37_v22 = vpop.xlane.xlu0 %36 }
  0x93   :  { %v42_v23 = vmul.f32 0.03125, %v37_v22 }
  0x95   :  { %v44_v24 = vadd.f32 1.1920929e-07, %v42_v23 }
  0x96   :  { %v40_v25 = vpop.xlane.xlu0 %39 }
  0x97   :  { %1181 = vrsqrt.f32 %v44_v24  ;;  %v43_v26 = vmul.f32 0.03125, %v40_v25 }
  0x99   :  { %v45_v27 = vadd.f32 1.1920929e-07, %v43_v26 }
  0x9a   :  { %v195_v16 = vpop.permute.xlu0 %194 }
  0x9b   :  { %1183 = vrsqrt.f32 %v45_v27 }
  0xa1   :  { %v1182_v28 = vpop.eup %1181 }
  0xa2   :  { %v48_v30 = vmul.f32 %v1182_v28, %v30_v0  ;;  %v181_v0 = vld [vmem:[%s1576_s7 + $0x68] sm:$0xff] }
  0xa4   :  { %v1322_v31 = vmul.f32 %v863_v29, %v48_v30 }
  0xa5   :  { %v1184_v32 = vpop.eup %1183 }
  0xa6   :  { %864 = vmatmul.mubr.msk.f32.vlgmr.msra.gmra.mrb[0].mxu0 %vm34_vm0, %v1322_v31  ;;  %v49_v33 = vmul.f32 %v1184_v32, %v31_v1  ;;  %v183_v1 = vld [vmem:[%s1576_s7 + $0x78] sm:$0xff]  ;;  %v209_v32 = vpop.permute.xlu0 %208 }
  0xa7   :  { %143 = vmatprep.mubr.f32.mxu0 %v1229_v13  ;;  %1078 = vmatpush3.bf16.msra.mxu0 %v1075_v21 }
  0xa8   :  { %v1327_v34 = vmul.f32 %v863_v29, %v49_v33  ;;  %1080 = vmatprep.subr.bf16.mxu0 %v1079_v37 }
  0xaa   :  { %865 = vmatmul.mubr.msk.f32.gmra.mrb[2].mxu0 %vm34_vm0, %v1327_v34 }
  0xab   :  { %1082 = vmatpush3.bf16.msra.mxu0 %v1079_v37 }
  0xac   :  { %1084 = vmatprep.subr.bf16.mxu0 %v1083_v41 }
  0xaf   :  { %1086 = vmatpush3.bf16.msra.mxu0 %v1083_v41 }
  0xb0   :  { %1088 = vmatprep.subr.bf16.mxu0 %v1087_v45 }
  0xb3   :  { %1090 = vmatpush3.bf16.msra.mxu0 %v1087_v45 }
 0x179   :  { %v139_v48 = vpop.f32.mrb[0].mxu0 }
 0x17a   :  { %v154_v49 = vmul.f32 %v150_v46, %v139_v48  ;;  %v141_v50 = vpop.f32.mrb[1].mxu0 }
 0x17b   :  { %v155_v54 = vmul.f32 %v151_v47, %v141_v50 }
 0x17c   :  { %160 = vrot.lane.b32.xlu1 %v154_v49, %s1231_s10 }
 0x17d   :  { %v145_v57 = vpop.f32.mrb[2].mxu0  ;;  %v228_v58 = vmul.f32 %v180_v51, %v155_v54  ;;  %v230_v59 = vmul.f32 %v182_v52, %v155_v54  ;;  %v232_v60 = vmul.f32 %v184_v53, %v155_v54  ;;  %v226_v3 = vmul.f32 %v178_v38, %v155_v54 }
 0x17e   :  { %v156_v61 = vmul.f32 %v152_v55, %v145_v57  ;;  %v147_v62 = vpop.f32.mrb[3].mxu0  ;;  %v168_v57 = vld [vmem:[%s1576_s7] sm:$0xff] }
 0x17f   :  { %v157_v2 = vmul.f32 %v153_v56, %v147_v62  ;;  %v169_v56 = vld [vmem:[%s1576_s7 + $0x8] sm:$0xff] }
 0x180   :  { %162 = vrot.lane.b32.xlu1 %v156_v61, %s1231_s10 }
 0x181   :  { %v233_v4 = vmul.f32 %v185_v42, %v157_v2  ;;  %v227_v5 = vmul.f32 %v179_v63, %v157_v2  ;;  %v229_v6 = vmul.f32 %v181_v0, %v157_v2  ;;  %v231_v7 = vmul.f32 %v183_v1, %v157_v2  ;;  %v645_v42 = vld [vmem:[%s1573_s4] sm:$0xff] }
 0x183   :  { %v1387_v8 = vpack.c.bf16 %v227_v5, %v226_v3  ;;  %v1389_v9 = vpack.c.bf16 %v229_v6, %v228_v58  ;;  %v1391_v10 = vpack.c.bf16 %v231_v7, %v230_v59  ;;  %v1393_v11 = vpack.c.bf16 %v233_v4, %v232_v60 }
 0x184   :  { %196 = vrot.lane.b32.xlu1 %v179_v63, %s1230_s15 }
 0x185   :  { %1092 = vmatprep.subr.bf16.mxu0 %v1387_v8 }
 0x188   :  { %198 = vrot.lane.b32.xlu1 %v180_v51, %s1230_s15 }
 0x18c   :  { %200 = vrot.lane.b32.xlu1 %v181_v0, %s1230_s15 }
 0x190   :  { %202 = vrot.lane.b32.xlu1 %v182_v52, %s1230_s15 }
 0x194   :  { %204 = vrot.lane.b32.xlu1 %v183_v1, %s1230_s15 }
 0x198   :  { %206 = vrot.lane.b32.xlu1 %v184_v53, %s1230_s15 }
 0x1ee   :  { %v161_v12 = vpop.permute.xlu1 %160 }
 0x1ef   :  { %v166_v14 = vadd.f32 %v161_v12, %v154_v49  ;;  %v542_v12 = vld [vmem:[%s1572_s3] sm:$0xff] }
 0x1f1   :  { %956 = vmatprep.mubr.msk.f32.mxu1 %vm34_vm0, %v166_v14  ;;  %v218_v19 = vmul.f32 %v195_v16, %v166_v14 }
 0x1f2   :  { %v163_v15 = vpop.permute.xlu1 %162 }
 0x1f3   :  { %v167_v17 = vadd.f32 %v163_v15, %v156_v61 }
 0x1f5   :  { %v225_v36 = vmul.f32 %v209_v32, %v167_v17 }
 0x1f6   :  { %v197_v18 = vpop.permute.xlu1 %196 }
 0x1f7   :  { %v219_v20 = vmul.f32 %v197_v18, %v167_v17 }
 0x1f9   :  { %v1161_v21 = vpack.i.bf16 %v219_v20, %v218_v19 }
 0x1fa   :  { %v199_v22 = vpop.permute.xlu1 %198 }
 0x1fb   :  { %1162 = vrot.lane.b32.xlu1 %v1161_v21, %s1230_s15  ;;  %v220_v24 = vmul.f32 %v199_v22, %v166_v14 }
 0x1fe   :  { %v201_v23 = vpop.permute.xlu1 %200 }
 0x1ff   :  { %v221_v25 = vmul.f32 %v201_v23, %v167_v17 }
 0x201   :  { %v1166_v26 = vpack.i.bf16 %v221_v25, %v220_v24  ;;  %v544_v24 = vld [vmem:[%s1572_s3 + $0x10] sm:$0xff]  ;;  %v545_v25 = vld [vmem:[%s1572_s3 + $0x18] sm:$0xff] }
 0x202   :  { %v203_v27 = vpop.permute.xlu1 %202 }
 0x203   :  { %1167 = vrot.lane.b32.xlu0 %v1166_v26, %s1230_s15  ;;  %v222_v29 = vmul.f32 %v203_v27, %v166_v14 }
 0x206   :  { %v205_v28 = vpop.permute.xlu1 %204 }
 0x207   :  { %v223_v30 = vmul.f32 %v205_v28, %v167_v17  ;;  %v1111_v28 = vpack.c.bf16 %v545_v25, %v544_v24 }
 0x209   :  { %v1171_v33 = vpack.i.bf16 %v223_v30, %v222_v29 }
 0x20a   :  { %v207_v35 = vpop.permute.xlu1 %206 }
 0x20b   :  { %v224_v37 = vmul.f32 %v207_v35, %v166_v14  ;;  %1172 = vrot.lane.b32.xlu1 %v1171_v33, %s1230_s15 }
 0x20d   :  { %v1176_v38 = vpack.i.bf16 %v225_v36, %v224_v37 }
 0x20f   :  { %1177 = vrot.lane.b32.xlu0 %v1176_v38, %s1230_s15 }
 0x26d   :  { %v1163_v39 = vpop.permute.xlu1 %1162 }
 0x26e   :  { %v1165_v40 = vunpack.i.h.bf16 %v1163_v39  ;;  %v1164_v41 = vunpack.i.l.bf16 %v1163_v39 }
 0x270   :  { %v1051_v43 = vpack.c.bf16 %v1165_v40, %v1164_v41 }
 0x272   :  { %1053 = vmatprep.subr.msk.bf16.mxu1 %vm1409_vm1, %v1051_v43 }
 0x273   :  { %1056 = vmatpush3.bf16.xpose.msk.msra.mxu1 %vm1409_vm1, %v1051_v43  ;;  %v647_v43 = vld [vmem:[%s1573_s4 + $0x10] sm:$0xff] }
 0x275   :  { %v1168_v44 = vpop.permute.xlu0 %1167 }
 0x276   :  { %v1170_v45 = vunpack.i.h.bf16 %v1168_v44  ;;  %v1169_v46 = vunpack.i.l.bf16 %v1168_v44  ;;  %v1117_v44 = vpack.c.bf16 %v647_v43, %v645_v42 }
 0x278   :  { %v1057_v47 = vpack.c.bf16 %v1170_v45, %v1169_v46  ;;  %v650_v45 = vld [vmem:[%s1573_s4 + $0x28] sm:$0xff]  ;;  %v652_v46 = vld [vmem:[%s1573_s4 + $0x38] sm:$0xff] }
 0x27a   :  { %1059 = vmatprep.subr.msk.bf16.mxu1 %vm1409_vm1, %v1057_v47 }
 0x27b   :  { %1062 = vmatpush3.bf16.xpose.msk.msra.mxu1 %vm1409_vm1, %v1057_v47  ;;  %v1119_v47 = vpack.c.bf16 %v652_v46, %v650_v45 }
 0x27d   :  { %v1173_v48 = vpop.permute.xlu1 %1172 }
 0x27e   :  { %v1175_v49 = vunpack.i.h.bf16 %v1173_v48  ;;  %v1174_v50 = vunpack.i.l.bf16 %v1173_v48  ;;  %v649_v48 = vld [vmem:[%s1573_s4 + $0x20] sm:$0xff] }
 0x280   :  { %v1063_v51 = vpack.c.bf16 %v1175_v49, %v1174_v50  ;;  %v651_v49 = vld [vmem:[%s1573_s4 + $0x30] sm:$0xff] }
 0x281   :  { %v1178_v52 = vpop.permute.xlu0 %1177  ;;  %v1121_v50 = vpack.c.bf16 %v651_v49, %v649_v48 }
 0x282   :  { %v1180_v53 = vunpack.i.h.bf16 %v1178_v52  ;;  %v1179_v54 = vunpack.i.l.bf16 %v1178_v52  ;;  %1065 = vmatprep.subr.msk.bf16.mxu1 %vm1409_vm1, %v1063_v51 }
 0x283   :  { %1068 = vmatpush3.bf16.xpose.msk.msra.mxu1 %vm1409_vm1, %v1063_v51 }
 0x284   :  { %v1069_v55 = vpack.c.bf16 %v1180_v53, %v1179_v54 }
 0x286   :  { %1071 = vmatprep.subr.msk.bf16.mxu1 %vm1409_vm1, %v1069_v55 }
 0x28b   :  { %1074 = vmatpush3.bf16.xpose.msk.msra.mxu1 %vm1409_vm1, %v1069_v55 }
 0x292   :  { %957 = vmatmul.mubr.msk.f32.vlgmr.msra.gmra.mrb[0].mxu1 %vm34_vm0, %v167_v17 }
 0x365   :  { %v958_v58 = vpop.f32.mrb[0].mxu1 }
 0x366   :  { %v352_v59 = vadd.f32 %v958_v58, %v169_v56  ;;  %v346_v60 = vpop.f32.mrb[1].mxu1 }
 0x367   :  { %v347_v61 = vadd.f32 %v346_v60, %v168_v57 }
 0x368   :  { %v359_v62 = vsel %vm355_vm2, %v352_v59, -inf }
 0x369   :  { %360 = vmax.xlane.f32.xlu0 %v359_v62  ;;  %v356_v63 = vsel %vm355_vm2, %v347_v61, -inf  ;;  %v753_v62 = vld [vmem:[%s1574_s5 + $0x8] sm:$0xff] }
 0x36a   :  { %357 = vmax.xlane.f32.xlu1 %v356_v63 }
 0x3f6   :  { %v361_v0 = vpop.xlane.xlu0 %360 }
 0x3f7   :  { %v363_v1 = vsub.f32 %v352_v59, %v361_v0  ;;  %v358_v2 = vpop.xlane.xlu1 %357  ;;  %v754_v0 = vld [vmem:[%s1574_s5 + $0x10] sm:$0xff] }
 0x3f8   :  { %v362_v3 = vsub.f32 %v347_v61, %v358_v2  ;;  %v752_v61 = vld [vmem:[%s1574_s5] sm:$0xff] }
 0x3f9   :  { %v366_v4 = vmul.f32 1.442695, %v363_v1  ;;  %v1123_v63 = vpack.c.bf16 %v753_v62, %v752_v61  ;;  %v756_v2 = vld [vmem:[%s1574_s5 + $0x20] sm:$0xff] }
 0x3fa   :  { %v364_v5 = vmul.f32 1.442695, %v362_v3  ;;  %v757_v3 = vld [vmem:[%s1574_s5 + $0x28] sm:$0xff] }
 0x3fb   :  { %1124 = vmatprep.subr.bf16.mxu1 %v1123_v63 }
 0x3fc   :  { %1185 = vpow2.f32 %v364_v5  ;;  %1126 = vmatpush3.bf16.msra.mxu1 %v1123_v63  ;;  %v758_v5 = vld [vmem:[%s1574_s5 + $0x30] sm:$0xff] }
 0x3fd   :  { %1187 = vpow2.f32 %v366_v4  ;;  %v1131_v4 = vpack.c.bf16 %v757_v3, %v756_v2 }
 0x406   :  { %v1186_v6 = vpop.eup %1185 }
 0x407   :  { %v1188_v7 = vpop.eup %1187  ;;  %975 = vmatprep.mubr.msk.f32.mxu0 %vm355_vm2, %v1186_v6 }
 0x408   :  { %976 = vmatmul.mubr.msk.f32.vlgmr.msra.gmra.mrb[4].mxu0 %vm355_vm2, %v1188_v7 }
 0x409   :  { %1094 = vmatpush3.bf16.msra.mxu0 %v1387_v8  ;;  %v543_v8 = vld [vmem:[%s1572_s3 + $0x8] sm:$0xff] }
 0x40a   :  { %1096 = vmatprep.subr.bf16.mxu0 %v1389_v9  ;;  %v1107_v14 = vpack.c.bf16 %v543_v8, %v542_v12  ;;  %v760_v12 = vld [vmem:[%s1574_s5 + $0x40] sm:$0xff]  ;;  %v761_v8 = vld [vmem:[%s1574_s5 + $0x48] sm:$0xff] }
 0x40d   :  { %1098 = vmatpush3.bf16.msra.mxu0 %v1389_v9 }
 0x40e   :  { %1100 = vmatprep.subr.bf16.mxu0 %v1391_v10 }
 0x411   :  { %1102 = vmatpush3.bf16.msra.mxu0 %v1391_v10 }
 0x412   :  { %1104 = vmatprep.subr.bf16.mxu0 %v1393_v11 }
 0x415   :  { %1106 = vmatpush3.bf16.msra.mxu0 %v1393_v11 }
 0x416   :  { %1108 = vmatprep.subr.bf16.mxu0 %v1107_v14 }
 0x4db   :  { %v977_v15 = vpop.f32.mrb[4].mxu0 }
 0x4dc   :  { %v450_v9 = vmax.f32 %v977_v15, 1e-30  ;;  %v440_v16 = vpop.f32.mrb[5].mxu0  ;;  %v762_v15 = vld [vmem:[%s1574_s5 + $0x50] sm:$0xff] }
 0x4dd   :  { %v449_v17 = vmax.f32 %v440_v16, 1e-30 }
 0x4de   :  { %1189 = vrcp.f32 %v450_v9 }
 0x4df   :  { %1191 = vrcp.f32 %v449_v17 }
 0x4e8   :  { %v1190_v10 = vpop.eup %1189 }
 0x4e9   :  { %v1192_v18 = vpop.eup %1191  ;;  %v454_v19 = vmul.f32 %v1190_v10, %v450_v9  ;;  %v763_v9 = vld [vmem:[%s1574_s5 + $0x58] sm:$0xff] }
 0x4ea   :  { %v453_v11 = vmul.f32 %v1192_v18, %v449_v17  ;;  %v1143_v16 = vpack.c.bf16 %v763_v9, %v762_v15  ;;  %v764_v17 = vld [vmem:[%s1574_s5 + $0x60] sm:$0xff] }
 0x4eb   :  { %v456_v20 = vsub.f32 2.0, %v454_v19  ;;  %v766_v19 = vld [vmem:[%s1574_s5 + $0x70] sm:$0xff] }
 0x4ec   :  { %v455_v21 = vsub.f32 2.0, %v453_v11  ;;  %v767_v11 = vld [vmem:[%s1574_s5 + $0x78] sm:$0xff] }
 0x4ed   :  { %v458_v22 = vmul.f32 %v1190_v10, %v456_v20  ;;  %v765_v10 = vld [vmem:[%s1574_s5 + $0x68] sm:$0xff]  ;;  %v1151_v20 = vpack.c.bf16 %v767_v11, %v766_v19 }
 0x4ee   :  { %v457_v23 = vmul.f32 %v1192_v18, %v455_v21  ;;  %v1147_v18 = vpack.c.bf16 %v765_v10, %v764_v17 }
 0x4ef   :  { %v460_v27 = vmul.f32 %v1188_v7, %v458_v22 }
 0x4f0   :  { %v459_v26 = vmul.f32 %v1186_v6, %v457_v23  ;;  %v759_v6 = vld [vmem:[%s1574_s5 + $0x38] sm:$0xff] }
 0x4f1   :  { %v1135_v7 = vpack.c.bf16 %v759_v6, %v758_v5 }
 0x4f2   :  { %994 = vmatprep.mubr.msk.f32.mxu0 %vm355_vm2, %v459_v26 }
 0x4f3   :  { %995 = vmatmul.mubr.msk.f32.vlgmr.msra.gmra.mrb[6].mxu0 %vm355_vm2, %v460_v27 }
 0x4f4   :  { %1110 = vmatpush3.bf16.msra.mxu0 %v1107_v14  ;;  %v1139_v14 = vpack.c.bf16 %v761_v8, %v760_v12 }
 0x4f5   :  { %1112 = vmatprep.subr.bf16.mxu0 %v1111_v28 }
 0x4f8   :  { %1114 = vmatpush3.bf16.msra.mxu0 %v1111_v28 }
 0x5c6   :  { %v996_v29 = vpop.f32.mrb[6].mxu0 }
 0x5c7   :  { %v533_v30 = vpop.f32.mrb[7].mxu0 }
 0x5c8   :  { %1005 = vmatprep.mubr.msk.f32.mxu0 %vm34_vm0, %v533_v30 }
 0x5c9   :  { %1006 = vmatmul.mubr.msk.f32.vlgmr.msra.gmra.mrb[8].mxu0 %vm34_vm0, %v996_v29 }
 0x5ca   :  { %723 = vmatprep.mubr.f32.mxu0 %v1229_v13 }
 0x69c   :  { %v1007_v32 = vpop.f32.mrb[8].mxu0 }
 0x69d   :  { %v1465_v33 = vadd.f32 %v1007_v32, %v1327_v34  ;;  %v618_v35 = vpop.f32.mrb[9].mxu0  ;;  %v646_v34 = vld [vmem:[%s1573_s4 + $0x8] sm:$0xff] }
 0x69e   :  { %v1468_v36 = vadd.f32 %v618_v35, %v1322_v31  ;;  %v648_v31 = vld [vmem:[%s1573_s4 + $0x18] sm:$0xff] }
 0x69f   :  { %v630_v37 = vmul.f32 %v1465_v33, %v1465_v33  ;;  %v1115_v41 = vpack.c.bf16 %v648_v31, %v646_v34 }
 0x6a0   :  { %v629_v38 = vmul.f32 %v1468_v36, %v1468_v36 }
 0x6a1   :  { %v634_v39 = vsel %vm34_vm0, %v630_v37, 0.0  ;;  %1116 = vmatprep.subr.bf16.mxu0 %v1115_v41 }
 0x6a2   :  { %635 = vadd.xlane.f32.xlu1 %v634_v39  ;;  %v631_v40 = vsel %vm34_vm0, %v629_v38, 0.0  ;;  %1118 = vmatpush1.bf16.msra.mxu0 %v1117_v44 }
 0x6a3   :  { %632 = vadd.xlane.f32.xlu0 %v631_v40  ;;  %1120 = vmatprep.subr.bf16.mxu0 %v1119_v47 }
 0x6a6   :  { %1122 = vmatpush1.bf16.msra.mxu0 %v1121_v50 }
 0x72f   :  { %v636_v51 = vpop.xlane.xlu1 %635 }
 0x730   :  { %v638_v52 = vmul.f32 0.03125, %v636_v51  ;;  %v633_v53 = vpop.xlane.xlu0 %632 }
 0x731   :  { %v637_v54 = vmul.f32 0.03125, %v633_v53 }
 0x732   :  { %v640_v55 = vadd.f32 1.1920929e-07, %v638_v52 }
 0x733   :  { %v639_v56 = vadd.f32 1.1920929e-07, %v637_v54 }
 0x735   :  { %1193 = vrsqrt.f32 %v639_v56 }
 0x736   :  { %1195 = vrsqrt.f32 %v640_v55 }
 0x73f   :  { %v1194_v57 = vpop.eup %1193 }
 0x740   :  { %v643_v58 = vmul.f32 %v1194_v57, %v1468_v36  ;;  %v1196_v59 = vpop.eup %1195 }
 0x741   :  { %v644_v60 = vmul.f32 %v1196_v59, %v1465_v33 }
 0x742   :  { %882 = vmatmul.mubr.msk.f32.vlgmr.msra.gmra.mrb[10].mxu0 %vm34_vm0, %v643_v58 }
 0x743   :  { %729 = vmatprep.mubr.f32.mxu0 %v1229_v13  ;;  %v755_v13 = vld [vmem:[%s1574_s5 + $0x18] sm:$0xff]  ;;  %s1232_s5 = smov [#allocation2]  }
 0x744   :  { %v1127_v1 = vpack.c.bf16 %v755_v13, %v754_v0  ;;  %s852_s19 = sshll.u32 %s1232_s5, 4  ;;  %s853_s19 = int_to_ptr.vmem [resolvable:$true] %s852_s19 }
 0x745   :  { %s1205_s20 = scalar_lea.vmem %s853_s19, 256  ;;  %p1210_p1 = scmp.lt.s32.totalorder %s853_s19, %s853_s19 }
 0x746   :  { %883 = vmatmul.mubr.msk.f32.gmra.mrb[12].mxu0 %vm34_vm0, %v644_v60  ;;  %1128 = vmatprep.subr.bf16.mxu1 %v1127_v1  ;;  %p1206_p0 = scmp.ne.s32.totalorder %s853_s19, %s1205_s20  ;;  %p1211_p2 = scmp.lt.s32.totalorder %s1205_s20, %s1205_s20 }
 0x747   :  { %1130 = vmatpush3.bf16.msra.mxu1 %v1127_v1 }
 0x748   :  { %1132 = vmatprep.subr.bf16.mxu1 %v1131_v4  ;;  %p1212_p3 = por %p1211_p2, %p1210_p1 }
 0x74a   :  { %p1213_p4 = pnand %p1212_p3, %p1206_p0 }
 0x74b   :  { %1134 = vmatpush3.bf16.msra.mxu1 %v1131_v4 }
 0x74c   :  { %1136 = vmatprep.subr.bf16.mxu1 %v1135_v7 }
 0x74f   :  { %1138 = vmatpush3.bf16.msra.mxu1 %v1135_v7 }
 0x750   :  { %1140 = vmatprep.subr.bf16.mxu1 %v1139_v14 }
 0x753   :  { %1142 = vmatpush3.bf16.msra.mxu1 %v1139_v14 }
 0x754   :  { %1144 = vmatprep.subr.bf16.mxu1 %v1143_v16 }
 0x757   :  { %1146 = vmatpush3.bf16.msra.mxu1 %v1143_v16 }
 0x758   :  { %1148 = vmatprep.subr.bf16.mxu1 %v1147_v18 }
 0x75b   :  { %1150 = vmatpush3.bf16.msra.mxu1 %v1147_v18 }
 0x75c   :  { %1152 = vmatprep.subr.bf16.mxu1 %v1151_v20 }
 0x75f   :  { %1154 = vmatpush3.bf16.msra.mxu1 %v1151_v20 }
 0x815   :  { %v725_v21 = vpop.f32.mrb[10].mxu0 }
 0x816   :  { %v727_v22 = vpop.f32.mrb[11].mxu0 }
 0x817   :  { %v884_v23 = vmul.f32 -1.442695, %v727_v22 }
 0x819   :  { %1197 = vpow2.f32 %v884_v23  ;;  %v731_v24 = vpop.f32.mrb[12].mxu0 }
 0x81a   :  { %v733_v25 = vpop.f32.mrb[13].mxu0 }
 0x81b   :  { %v885_v26 = vmul.f32 -1.442695, %v733_v25 }
 0x81d   :  { %1199 = vpow2.f32 %v885_v26 }
 0x823   :  { %v1198_v27 = vpop.eup %1197 }
 0x824   :  { %v742_v28 = vadd.f32 1.0, %v1198_v27 }
 0x826   :  { %1201 = vrcp.f32 %v742_v28 }
 0x827   :  { %v1200_v29 = vpop.eup %1199 }
 0x828   :  { %v743_v30 = vadd.f32 1.0, %v1200_v29 }
 0x82a   :  { %1203 = vrcp.f32 %v743_v30 }
 0x830   :  { %v1202_v32 = vpop.eup %1201 }
 0x831   :  { %v748_v35 = vmul.f32 %v1202_v32, %v727_v22 }
 0x833   :  { %v750_v37 = vmul.f32 %v748_v35, %v725_v21 }
 0x834   :  { %v1204_v38 = vpop.eup %1203 }
 0x835   :  { %v749_v39 = vmul.f32 %v1204_v38, %v733_v25  ;;  %1040 = vmatprep.mubr.f32.mxu1 %v750_v37 }
 0x837   :  { %v751_v40 = vmul.f32 %v749_v39, %v731_v24 }
 0x839   :  { %1041 = vmatmul.mubr.f32.vlgmr.msra.gmra.mrb[2].mxu1 %v751_v40 }
 0x90c   :  { %v1042_v34 = vpop.f32.mrb[2].mxu1 }
 0x90d   :  { %v844_v31 = vadd.f32 %v1042_v34, %v1465_v33  ;;  %v834_v41 = vpop.f32.mrb[3].mxu1 }
 0x90e   :  { %v843_v42 = vadd.f32 %v834_v41, %v1468_v36 }
 0x90f   :  { %846 = vst.msk [vmem:[#allocation2 + $0x8] sm:$0xff] %vm34_vm0, %v844_v31 }
 0x910   :  { %845 = vst.msk [vmem:[#allocation2] sm:$0xff] %vm34_vm0, %v843_v42 }
 0x911   :  { %1216 = shalt.err (!%p1213_p4)
}
 0x912   :  { %s1217_s22 = scalar_lea.hbm %s1577_s8, 256 }
 0x913   :  { %p1218_p5 = scmp.ne.s32.totalorder %s1577_s8, %s1217_s22  ;;  %p1221_p6 = scmp.lt.u32.totalorder %s1217_s22, %s1577_s8 }
 0x915   :  { %p1223_p7 = pnand %p1221_p6, %p1218_p5 }
 0x917   :  { %1226 = shalt.err (!%p1223_p7)
}
 0x918   :  { %s1233_s27 = smov 128   ;;  %s1234_s3 = smov 8  }
 0x919   :  { %858 = dma.vmem_to_hbm [thread:$0]  %s853_s19, 256, %s1577_s8, [#allocation3], %s1233_s27, %s1233_s27, %s1234_s3  }
 0x91a   :  { %1227 = dma.done.wait [#allocation3], 256  }
 0x91b   :  { %1228 = vsyncadd [#allocation3], 4294967040 }
 0x91c   :  { %862 = vsyncpa [#allocation3], 1 }

</bundles_post_ra>
